<compile_context>
chip_gen: v5e
topology: v5e:2x2
jax: 0.10.0
libtpu: 0.0.40
codegen_flags: <defaults>
</compile_context>

<pallas_src>
import jax
import jax.numpy as jnp
from jax import lax
from jax.experimental import pallas as pl
from jax.experimental.pallas import tpu as pltpu


# ----------------------------------------------------------------------------
# Model dimensions (from the PyTorch CNNModel spec)
# ----------------------------------------------------------------------------
D_IN = 310          # raw input features
D_FEAT = 128        # feature extractor width
D_HID = 64          # per-head hidden width
N_CLASS = 3         # class logits
N_DOMAIN = 2        # domain logits
OUT_LANES = 128     # lane-dense output slab width
BN_EPS = 1e-5


def _round_up(a, m):
    return ((a + m - 1) // m) * m


def _cdiv(a, b):
    return -(-a // b)


def _choose_tile(B):
    """Pick (TB, B_pad): big tiles (amortize ~0.35us/step overhead), and at
    least 2 grid steps when the batch is large enough so v7x's second
    TensorCore gets work."""
    B8 = _round_up(B, 8)
    if B8 < 512:
        return B8, B8                         # single tile, no row waste
    n_tiles = max(2, _cdiv(B8, 1024))         # >=2 steps, tiles <= ~1024 rows
    TB = min(1024, _round_up(_cdiv(B8, n_tiles), 8))
    return TB, _round_up(B8, TB)


# ----------------------------------------------------------------------------
# Kernel
# ----------------------------------------------------------------------------
def cnn_kernel(x_ref, w1_ref, ws_ref, bs_ref, out_ref):
    """Fused DANN forward for one batch tile.

    x_ref  : (TB, 310) f32     input tile (rows may be zero-padded)
    w1_ref : (310, 128) bf16   folded f_fc1 (+ f_bn1) weight
    ws_ref : (4, 128, 128) bf16 stacked folded weights:
               [0] f_fc2 (+ f_bn2)
               [1] fused head layer 1  [c_fc1 | d_fc1]
               [2] fused head layer 2  diag(c_fc2, d_fc2)
               [3] fused head layer 3  (class -> lanes 0:3, domain -> 3:5)
    bs_ref : (5, 128) f32      matching folded biases
    out_ref: (TB, 128) f32     lane-dense output slab:
               lanes 0:3 = class log-probs, lanes 3:5 = domain log-probs
    """
    b = bs_ref[...]                                        # (5, 128) f32

    # ---- feature extractor (BN folded, Dropout identity), bf16 MXU / f32 acc
    xb = x_ref[...].astype(jnp.bfloat16)                   # (TB, 310)
    h = jnp.maximum(
        jnp.dot(xb, w1_ref[...], preferred_element_type=jnp.float32)
        + b[0:1, :], 0.0)
    feat = jnp.maximum(
        jnp.dot(h.astype(jnp.bfloat16), ws_ref[0],
                preferred_element_type=jnp.float32) + b[1:2, :], 0.0)

    # ReverseLayerF is identity in the forward pass -> both heads read `feat`.
    # ---- fused class + domain heads (one 128-lane path) ----
    h1 = jnp.maximum(
        jnp.dot(feat.astype(jnp.bfloat16), ws_ref[1],
                preferred_element_type=jnp.float32) + b[2:3, :], 0.0)
    h2 = jnp.maximum(
        jnp.dot(h1.astype(jnp.bfloat16), ws_ref[2],
                preferred_element_type=jnp.float32) + b[3:4, :], 0.0)
    logits = (jnp.dot(h2.astype(jnp.bfloat16), ws_ref[3],
                      preferred_element_type=jnp.float32) + b[4:5, :])

    # ---- masked log-softmax on an 8-lane slice (only 5 lanes are valid) ----
    lg = logits[:, 0:8]                                    # (TB, 8)
    lane8 = lax.broadcasted_iota(jnp.int32, lg.shape, 1)
    neg = jnp.float32(-1e30)
    cl = jnp.where(lane8 < N_CLASS, lg, neg)
    dl = jnp.where((lane8 >= N_CLASS) & (lane8 < N_CLASS + N_DOMAIN), lg, neg)
    m_c = jnp.max(cl, axis=1, keepdims=True)
    m_d = jnp.max(dl, axis=1, keepdims=True)
    lse_c = m_c + jnp.log(jnp.sum(jnp.exp(cl - m_c), axis=1, keepdims=True))
    lse_d = m_d + jnp.log(jnp.sum(jnp.exp(dl - m_d), axis=1, keepdims=True))

    # ---- lane-dense writeback: class -> lanes 0:3, domain -> lanes 3:5 ----
    lane = lax.broadcasted_iota(jnp.int32, logits.shape, 1)
    cmask = lane < N_CLASS
    dmask = (lane >= N_CLASS) & (lane < N_CLASS + N_DOMAIN)
    out_ref[...] = jnp.where(cmask, logits - lse_c,
                             jnp.where(dmask, logits - lse_d, 0.0))


# ----------------------------------------------------------------------------
# Parameter preparation (pure wrapper work)
# ----------------------------------------------------------------------------
def _fold_bn(w, bias, gamma, beta, mean, var, eps=BN_EPS):
    """Fold eval-mode BatchNorm1d into the preceding Linear: y = x @ W' + b'."""
    s = gamma / jnp.sqrt(var + eps)
    return w * s[None, :], bias * s + (beta - mean * s)


def pack_params(raw):
    """Fold BN, fuse the two heads, and pack into 3 slabs (weights in bf16)."""
    # --- feature extractor ---
    fw1, fb1 = _fold_bn(raw["f_fc1_w"], raw["f_fc1_b"], *raw["f_bn1"])
    fw2, fb2 = _fold_bn(raw["f_fc2_w"], raw["f_fc2_b"], *raw["f_bn2"])

    # --- heads (BN folded) ---
    cw1, cb1 = _fold_bn(raw["c_fc1_w"], raw["c_fc1_b"], *raw["c_bn1"])
    cw2, cb2 = _fold_bn(raw["c_fc2_w"], raw["c_fc2_b"], *raw["c_bn2"])
    cw3, cb3 = raw["c_fc3_w"], raw["c_fc3_b"]
    dw1, db1 = _fold_bn(raw["d_fc1_w"], raw["d_fc1_b"], *raw["d_bn1"])
    dw2, db2 = _fold_bn(raw["d_fc2_w"], raw["d_fc2_b"], *raw["d_bn2"])
    dw3, db3 = raw["d_fc3_w"], raw["d_fc3_b"]

    # Head layer 1: concat class|domain along output lanes -> (128, 128).
    hw1 = jnp.concatenate([cw1, dw1], axis=1)
    hb1 = jnp.concatenate([cb1, db1], axis=0)
    # Head layer 2: block diagonal -> (128, 128).
    z = jnp.zeros((D_HID, D_HID), jnp.float32)
    hw2 = jnp.block([[cw2, z], [z, dw2]])
    hb2 = jnp.concatenate([cb2, db2], axis=0)
    # Head layer 3: class logits -> lanes 0:3, domain logits -> lanes 3:5.
    hw3 = jnp.zeros((2 * D_HID, OUT_LANES), jnp.float32)
    hw3 = hw3.at[:D_HID, :N_CLASS].set(cw3)
    hw3 = hw3.at[D_HID:, N_CLASS:N_CLASS + N_DOMAIN].set(dw3)
    hb3 = jnp.zeros((OUT_LANES,), jnp.float32)
    hb3 = hb3.at[:N_CLASS].set(cb3)
    hb3 = hb3.at[N_CLASS:N_CLASS + N_DOMAIN].set(db3)

    w1 = fw1.astype(jnp.bfloat16)                                 # (310, 128)
    ws = jnp.stack([fw2, hw1, hw2, hw3], axis=0).astype(jnp.bfloat16)  # (4,128,128)
    bs = jnp.stack([fb1, fb2, hb1, hb2, hb3], axis=0)             # (5, 128) f32
    return w1, ws, bs


# ----------------------------------------------------------------------------
# Wrapper
# ----------------------------------------------------------------------------
def cnn_model_forward(x, packed_params, alpha=0.0):
    """x: (B, 310). Returns (class_log_probs (B,3), domain_log_probs (B,2)).

    `alpha` only scales the reversed gradient in backward; identity in forward.
    """
    del alpha
    w1, ws, bs = packed_params
    B = x.shape[0]
    x = x.astype(jnp.float32)
    TB, B_pad = _choose_tile(B)
    if B_pad != B:
        x = jnp.pad(x, ((0, B_pad - B), (0, 0)))   # rows only; lanes stay 310

    flops = 2 * B_pad * (D_IN * D_FEAT + 4 * D_FEAT * D_FEAT)
    bytes_accessed = (B_pad * (D_IN + OUT_LANES) * 4      # x in + out slab
                      + D_IN * D_FEAT * 2                 # w1 (bf16)
                      + 4 * D_FEAT * D_FEAT * 2           # ws (bf16)
                      + 5 * OUT_LANES * 4)                # biases (f32)
    transcendentals = B_pad * 10                          # 8 exp + 2 log / row

    out = pl.pallas_call(
        cnn_kernel,
        out_shape=jax.ShapeDtypeStruct((B_pad, OUT_LANES), jnp.float32),
        grid_spec=pltpu.PrefetchScalarGridSpec(
            num_scalar_prefetch=0,
            grid=(B_pad // TB,),
            in_specs=[
                pl.BlockSpec((TB, D_IN), lambda i: (i, 0)),
                pl.BlockSpec((D_IN, D_FEAT), lambda i: (0, 0)),
                pl.BlockSpec((4, D_FEAT, D_FEAT), lambda i: (0, 0, 0)),
                pl.BlockSpec((5, OUT_LANES), lambda i: (0, 0)),
            ],
            out_specs=pl.BlockSpec((TB, OUT_LANES), lambda i: (i, 0)),
        ),
        compiler_params=pltpu.CompilerParams(
            dimension_semantics=("parallel",)),
        cost_estimate=pl.CostEstimate(
            flops=flops,
            transcendentals=transcendentals,
            bytes_accessed=bytes_accessed),
    )(x, w1, ws, bs)

    class_out = out[:B, :N_CLASS]
    domain_out = out[:B, N_CLASS:N_CLASS + N_DOMAIN]
    return class_out, domain_out


# ----------------------------------------------------------------------------
# Deterministic params + pure-JAX reference (f32, unfolded, un-fused)
# ----------------------------------------------------------------------------
def init_raw_params(key):
    """Params matching nn.Linear / nn.BatchNorm1d shapes (eval mode).

    Linear weights are stored transposed as (in_features, out_features);
    biases / BN vectors are 1-D (out_features,).
    """
    dims = {
        "f_fc1": (D_IN, D_FEAT), "f_fc2": (D_FEAT, D_FEAT),
        "c_fc1": (D_FEAT, D_HID), "c_fc2": (D_HID, D_HID), "c_fc3": (D_HID, N_CLASS),
        "d_fc1": (D_FEAT, D_HID), "d_fc2": (D_HID, D_HID), "d_fc3": (D_HID, N_DOMAIN),
    }
    bns = {"f_bn1": D_FEAT, "f_bn2": D_FEAT,
           "c_bn1": D_HID, "c_bn2": D_HID,
           "d_bn1": D_HID, "d_bn2": D_HID}
    keys = iter(jax.random.split(key, 64))
    raw = {}
    for name, (fin, fout) in dims.items():
        bound = 1.0 / (fin ** 0.5)
        raw[name + "_w"] = jax.random.uniform(next(keys), (fin, fout),
                                              jnp.float32, -bound, bound)
        raw[name + "_b"] = jax.random.uniform(next(keys), (fout,),
                                              jnp.float32, -bound, bound)
    for name, fout in bns.items():
        gamma = 1.0 + 0.1 * jax.random.normal(next(keys), (fout,), jnp.float32)
        beta = 0.1 * jax.random.normal(next(keys), (fout,), jnp.float32)
        mean = 0.05 * jax.random.normal(next(keys), (fout,), jnp.float32)
        var = jnp.abs(1.0 + 0.1 * jax.random.normal(next(keys), (fout,), jnp.float32))
        raw[name] = (gamma, beta, mean, var)
    return raw


def reference_forward(x, raw):
    """Pure-JAX eval-mode reference (f32, no folding, no fusion)."""
    def bn(h, p):
        gamma, beta, mean, var = p
        return (h - mean) / jnp.sqrt(var + BN_EPS) * gamma + beta

    def layer(h, wname, bnname):
        h = h @ raw[wname + "_w"] + raw[wname + "_b"]
        return jnp.maximum(bn(h, raw[bnname]), 0.0)

    x = x.astype(jnp.float32)
    h = layer(x, "f_fc1", "f_bn1")
    feat = layer(h, "f_fc2", "f_bn2")
    c = layer(feat, "c_fc1", "c_bn1")
    c = layer(c, "c_fc2", "c_bn2")
    c_logits = c @ raw["c_fc3_w"] + raw["c_fc3_b"]
    d = layer(feat, "d_fc1", "d_bn1")
    d = layer(d, "d_fc2", "d_bn2")
    d_logits = d @ raw["d_fc3_w"] + raw["d_fc3_b"]
    return (jax.nn.log_softmax(c_logits, axis=1),
            jax.nn.log_softmax(d_logits, axis=1))


if __name__ == "__main__":
    key = jax.random.PRNGKey(0)
    key_x, key_p = jax.random.split(key)

    B = 8  # small batch, multiple of 8 sublanes
    x = jax.random.normal(key_x, (B, D_IN), dtype=jnp.float32)
    alpha = 0.5  # gradient-reversal coefficient: backward-only, unused in forward

    raw = init_raw_params(key_p)
    packed = pack_params(raw)

    class_out, domain_out = cnn_model_forward(x, packed, alpha)
    class_out = jax.block_until_ready(class_out)
    domain_out = jax.block_until_ready(domain_out)

    # sanity check against the pure-JAX f32 reference (kernel matmuls are bf16,
    # hence the relaxed tolerance)
    ref_c, ref_d = reference_forward(x, raw)
    assert class_out.shape == (B, N_CLASS) and domain_out.shape == (B, N_DOMAIN)
    assert jnp.allclose(class_out, ref_c, atol=5e-2, rtol=5e-2), \
        float(jnp.max(jnp.abs(class_out - ref_c)))
    assert jnp.allclose(domain_out, ref_d, atol=5e-2, rtol=5e-2), \
        float(jnp.max(jnp.abs(domain_out - ref_d)))

    print("KERNEL_OK")
</pallas_src>

<mosaic_0001>
module attributes {stable_mosaic.version = 11 : i64} {
  func.func @cnn_kernel(%arg0: i32, %arg1: memref<8x310xf32, #tpu.memory_space<vmem>>, %arg2: memref<310x128xbf16, #tpu.memory_space<vmem>>, %arg3: memref<4x128x128xbf16, #tpu.memory_space<vmem>>, %arg4: memref<5x128xf32, #tpu.memory_space<vmem>>, %arg5: memref<8x128xf32, #tpu.memory_space<vmem>>) attributes {dimension_semantics = [#tpu.dimension_semantics<parallel>], iteration_bounds = array<i64: 1>, scalar_prefetch = 0 : i64, scratch_operands = 0 : i64, tpu.core_type = #tpu.core_type<tc>, window_params = [{transform_indices = @transform_0, window_bounds = array<i64: 8, 310>}, {pipeline_mode = #tpu.pipeline_mode<synchronous>, transform_indices = @transform_1, window_bounds = array<i64: 310, 128>}, {pipeline_mode = #tpu.pipeline_mode<synchronous>, transform_indices = @transform_2, window_bounds = array<i64: 4, 128, 128>}, {pipeline_mode = #tpu.pipeline_mode<synchronous>, transform_indices = @transform_3, window_bounds = array<i64: 5, 128>}, {transform_indices = @transform_4, window_bounds = array<i64: 8, 128>}]} {
    %c0 = arith.constant 0 : index
    %c0_0 = arith.constant 0 : index
    %0 = vector.load %arg4[%c0, %c0_0] : memref<5x128xf32, #tpu.memory_space<vmem>>, vector<5x128xf32>
    %c0_1 = arith.constant 0 : index
    %c0_2 = arith.constant 0 : index
    %1 = vector.load %arg1[%c0_1, %c0_2] : memref<8x310xf32, #tpu.memory_space<vmem>>, vector<8x310xf32>
    %2 = arith.truncf %1 : vector<8x310xf32> to vector<8x310xbf16>
    %c0_3 = arith.constant 0 : index
    %c0_4 = arith.constant 0 : index
    %3 = vector.load %arg2[%c0_3, %c0_4] : memref<310x128xbf16, #tpu.memory_space<vmem>>, vector<310x128xbf16>
    %cst = arith.constant dense<0.000000e+00> : vector<8x128xf32>
    %4 = tpu.matmul %2, %3, %cst {dimension_numbers = #tpu.dot_dimension_numbers<[1], [0], [0], [1], [0, 0, 1, 1], [], []>} : vector<8x310xbf16>, vector<310x128xbf16>, vector<8x128xf32> -> vector<8x128xf32>
    %5 = vector.extract_strided_slice %0 {offsets = [0, 0], sizes = [1, 128], strides = [1, 1]} : vector<5x128xf32> to vector<1x128xf32>
    %6 = vector.broadcast %5 : vector<1x128xf32> to vector<8x128xf32>
    %7 = arith.addf %4, %6 : vector<8x128xf32>
    %cst_5 = arith.constant 0.000000e+00 : f32
    %8 = vector.broadcast %cst_5 : f32 to vector<8x128xf32>
    %9 = arith.maximumf %7, %8 : vector<8x128xf32>
    %10 = arith.truncf %9 : vector<8x128xf32> to vector<8x128xbf16>
    %c0_6 = arith.constant 0 : index
    %c0_7 = arith.constant 0 : index
    %c0_8 = arith.constant 0 : index
    %11 = vector.load %arg3[%c0_6, %c0_7, %c0_8] : memref<4x128x128xbf16, #tpu.memory_space<vmem>>, vector<1x128x128xbf16>
    %12 = vector.shape_cast %11 : vector<1x128x128xbf16> to vector<128x128xbf16>
    %cst_9 = arith.constant dense<0.000000e+00> : vector<8x128xf32>
    %13 = tpu.matmul %10, %12, %cst_9 {dimension_numbers = #tpu.dot_dimension_numbers<[1], [0], [0], [1], [0, 0, 1, 1], [], []>} : vector<8x128xbf16>, vector<128x128xbf16>, vector<8x128xf32> -> vector<8x128xf32>
    %14 = vector.extract_strided_slice %0 {offsets = [1, 0], sizes = [1, 128], strides = [1, 1]} : vector<5x128xf32> to vector<1x128xf32>
    %15 = vector.broadcast %14 : vector<1x128xf32> to vector<8x128xf32>
    %16 = arith.addf %13, %15 : vector<8x128xf32>
    %cst_10 = arith.constant 0.000000e+00 : f32
    %17 = vector.broadcast %cst_10 : f32 to vector<8x128xf32>
    %18 = arith.maximumf %16, %17 : vector<8x128xf32>
    %19 = arith.truncf %18 : vector<8x128xf32> to vector<8x128xbf16>
    %c1 = arith.constant 1 : index
    %c0_11 = arith.constant 0 : index
    %c0_12 = arith.constant 0 : index
    %20 = vector.load %arg3[%c1, %c0_11, %c0_12] : memref<4x128x128xbf16, #tpu.memory_space<vmem>>, vector<1x128x128xbf16>
    %21 = vector.shape_cast %20 : vector<1x128x128xbf16> to vector<128x128xbf16>
    %cst_13 = arith.constant dense<0.000000e+00> : vector<8x128xf32>
    %22 = tpu.matmul %19, %21, %cst_13 {dimension_numbers = #tpu.dot_dimension_numbers<[1], [0], [0], [1], [0, 0, 1, 1], [], []>} : vector<8x128xbf16>, vector<128x128xbf16>, vector<8x128xf32> -> vector<8x128xf32>
    %23 = vector.extract_strided_slice %0 {offsets = [2, 0], sizes = [1, 128], strides = [1, 1]} : vector<5x128xf32> to vector<1x128xf32>
    %24 = vector.broadcast %23 : vector<1x128xf32> to vector<8x128xf32>
    %25 = arith.addf %22, %24 : vector<8x128xf32>
    %cst_14 = arith.constant 0.000000e+00 : f32
    %26 = vector.broadcast %cst_14 : f32 to vector<8x128xf32>
    %27 = arith.maximumf %25, %26 : vector<8x128xf32>
    %28 = arith.truncf %27 : vector<8x128xf32> to vector<8x128xbf16>
    %c2 = arith.constant 2 : index
    %c0_15 = arith.constant 0 : index
    %c0_16 = arith.constant 0 : index
    %29 = vector.load %arg3[%c2, %c0_15, %c0_16] : memref<4x128x128xbf16, #tpu.memory_space<vmem>>, vector<1x128x128xbf16>
    %30 = vector.shape_cast %29 : vector<1x128x128xbf16> to vector<128x128xbf16>
    %cst_17 = arith.constant dense<0.000000e+00> : vector<8x128xf32>
    %31 = tpu.matmul %28, %30, %cst_17 {dimension_numbers = #tpu.dot_dimension_numbers<[1], [0], [0], [1], [0, 0, 1, 1], [], []>} : vector<8x128xbf16>, vector<128x128xbf16>, vector<8x128xf32> -> vector<8x128xf32>
    %32 = vector.extract_strided_slice %0 {offsets = [3, 0], sizes = [1, 128], strides = [1, 1]} : vector<5x128xf32> to vector<1x128xf32>
    %33 = vector.broadcast %32 : vector<1x128xf32> to vector<8x128xf32>
    %34 = arith.addf %31, %33 : vector<8x128xf32>
    %cst_18 = arith.constant 0.000000e+00 : f32
    %35 = vector.broadcast %cst_18 : f32 to vector<8x128xf32>
    %36 = arith.maximumf %34, %35 : vector<8x128xf32>
    %37 = arith.truncf %36 : vector<8x128xf32> to vector<8x128xbf16>
    %c3 = arith.constant 3 : index
    %c0_19 = arith.constant 0 : index
    %c0_20 = arith.constant 0 : index
    %38 = vector.load %arg3[%c3, %c0_19, %c0_20] : memref<4x128x128xbf16, #tpu.memory_space<vmem>>, vector<1x128x128xbf16>
    %39 = vector.shape_cast %38 : vector<1x128x128xbf16> to vector<128x128xbf16>
    %cst_21 = arith.constant dense<0.000000e+00> : vector<8x128xf32>
    %40 = tpu.matmul %37, %39, %cst_21 {dimension_numbers = #tpu.dot_dimension_numbers<[1], [0], [0], [1], [0, 0, 1, 1], [], []>} : vector<8x128xbf16>, vector<128x128xbf16>, vector<8x128xf32> -> vector<8x128xf32>
    %41 = vector.extract_strided_slice %0 {offsets = [4, 0], sizes = [1, 128], strides = [1, 1]} : vector<5x128xf32> to vector<1x128xf32>
    %42 = vector.broadcast %41 : vector<1x128xf32> to vector<8x128xf32>
    %43 = arith.addf %40, %42 : vector<8x128xf32>
    %44 = vector.extract_strided_slice %43 {offsets = [0, 0], sizes = [8, 8], strides = [1, 1]} : vector<8x128xf32> to vector<8x8xf32>
    %45 = tpu.iota {dimensions = array<i32: 1>} : vector<8x8xi32>
    %c3_i32 = arith.constant 3 : i32
    %46 = vector.broadcast %c3_i32 : i32 to vector<8x8xi32>
    %47 = arith.cmpi slt, %45, %46 : vector<8x8xi32>
    %cst_22 = arith.constant -1.000000e+30 : f32
    %48 = vector.broadcast %cst_22 : f32 to vector<8x8xf32>
    %49 = arith.select %47, %44, %48 : vector<8x8xi1>, vector<8x8xf32>
    %c3_i32_23 = arith.constant 3 : i32
    %50 = vector.broadcast %c3_i32_23 : i32 to vector<8x8xi32>
    %51 = arith.cmpi sge, %45, %50 : vector<8x8xi32>
    %c5_i32 = arith.constant 5 : i32
    %52 = vector.broadcast %c5_i32 : i32 to vector<8x8xi32>
    %53 = arith.cmpi slt, %45, %52 : vector<8x8xi32>
    %54 = arith.andi %51, %53 : vector<8x8xi1>
    %cst_24 = arith.constant -1.000000e+30 : f32
    %55 = vector.broadcast %cst_24 : f32 to vector<8x8xf32>
    %56 = arith.select %54, %44, %55 : vector<8x8xi1>, vector<8x8xf32>
    %cst_25 = arith.constant dense<0xFF800000> : vector<8xf32>
    %57 = vector.multi_reduction <maximumf>, %49, %cst_25 [1] : vector<8x8xf32> to vector<8xf32>
    %58 = vector.shape_cast %57 : vector<8xf32> to vector<8x1xf32>
    %cst_26 = arith.constant dense<0xFF800000> : vector<8xf32>
    %59 = vector.multi_reduction <maximumf>, %56, %cst_26 [1] : vector<8x8xf32> to vector<8xf32>
    %60 = vector.shape_cast %59 : vector<8xf32> to vector<8x1xf32>
    %61 = vector.broadcast %58 : vector<8x1xf32> to vector<8x8xf32>
    %62 = arith.subf %49, %61 : vector<8x8xf32>
    %63 = math.exp %62 : vector<8x8xf32>
    %cst_27 = arith.constant dense<0.000000e+00> : vector<8xf32>
    %64 = vector.multi_reduction <add>, %63, %cst_27 [1] : vector<8x8xf32> to vector<8xf32>
    %65 = vector.shape_cast %64 : vector<8xf32> to vector<8x1xf32>
    %66 = math.log %65 : vector<8x1xf32>
    %67 = arith.addf %58, %66 : vector<8x1xf32>
    %68 = vector.broadcast %60 : vector<8x1xf32> to vector<8x8xf32>
    %69 = arith.subf %56, %68 : vector<8x8xf32>
    %70 = math.exp %69 : vector<8x8xf32>
    %cst_28 = arith.constant dense<0.000000e+00> : vector<8xf32>
    %71 = vector.multi_reduction <add>, %70, %cst_28 [1] : vector<8x8xf32> to vector<8xf32>
    %72 = vector.shape_cast %71 : vector<8xf32> to vector<8x1xf32>
    %73 = math.log %72 : vector<8x1xf32>
    %74 = arith.addf %60, %73 : vector<8x1xf32>
    %75 = tpu.iota {dimensions = array<i32: 1>} : vector<8x128xi32>
    %c3_i32_29 = arith.constant 3 : i32
    %76 = vector.broadcast %c3_i32_29 : i32 to vector<8x128xi32>
    %77 = arith.cmpi slt, %75, %76 : vector<8x128xi32>
    %c3_i32_30 = arith.constant 3 : i32
    %78 = vector.broadcast %c3_i32_30 : i32 to vector<8x128xi32>
    %79 = arith.cmpi sge, %75, %78 : vector<8x128xi32>
    %c5_i32_31 = arith.constant 5 : i32
    %80 = vector.broadcast %c5_i32_31 : i32 to vector<8x128xi32>
    %81 = arith.cmpi slt, %75, %80 : vector<8x128xi32>
    %82 = arith.andi %79, %81 : vector<8x128xi1>
    %83 = vector.broadcast %67 : vector<8x1xf32> to vector<8x128xf32>
    %84 = arith.subf %43, %83 : vector<8x128xf32>
    %85 = vector.broadcast %74 : vector<8x1xf32> to vector<8x128xf32>
    %86 = arith.subf %43, %85 : vector<8x128xf32>
    %cst_32 = arith.constant 0.000000e+00 : f32
    %87 = vector.broadcast %cst_32 : f32 to vector<8x128xf32>
    %88 = arith.select %82, %86, %87 : vector<8x128xi1>, vector<8x128xf32>
    %89 = arith.select %77, %84, %88 : vector<8x128xi1>, vector<8x128xf32>
    %c0_33 = arith.constant 0 : index
    %c0_34 = arith.constant 0 : index
    %90 = vector.load %arg5[%c0_33, %c0_34] : memref<8x128xf32, #tpu.memory_space<vmem>>, vector<8x128xf32>
    tpu.vector_store %arg5[%c0_33, %c0_34], %89 {strides = array<i32>} : memref<8x128xf32, #tpu.memory_space<vmem>>, vector<8x128xf32>,
    return
  }
  func.func @transform_0(%arg0: i32) -> (i32, i32) {
    %c0_i32 = arith.constant 0 : i32
    %c0_i32_0 = arith.constant 0 : i32
    return %arg0, %c0_i32 : i32, i32
  }
  func.func @transform_1(%arg0: i32) -> (i32, i32) {
    %c0_i32 = arith.constant 0 : i32
    %c0_i32_0 = arith.constant 0 : i32
    %c0_i32_1 = arith.constant 0 : i32
    return %c0_i32, %c0_i32_0 : i32, i32
  }
  func.func @transform_2(%arg0: i32) -> (i32, i32, i32) {
    %c0_i32 = arith.constant 0 : i32
    %c0_i32_0 = arith.constant 0 : i32
    %c0_i32_1 = arith.constant 0 : i32
    %c0_i32_2 = arith.constant 0 : i32
    return %c0_i32, %c0_i32_0, %c0_i32_1 : i32, i32, i32
  }
  func.func @transform_3(%arg0: i32) -> (i32, i32) {
    %c0_i32 = arith.constant 0 : i32
    %c0_i32_0 = arith.constant 0 : i32
    %c0_i32_1 = arith.constant 0 : i32
    return %c0_i32, %c0_i32_0 : i32, i32
  }
  func.func @transform_4(%arg0: i32) -> (i32, i32) {
    %c0_i32 = arith.constant 0 : i32
    %c0_i32_0 = arith.constant 0 : i32
    return %arg0, %c0_i32 : i32, i32
  }
}

</mosaic_0001>

<bundles_post_ra>
// kernel: tpu_custom_call.1
= control target key start
LH: loop header
LB: loop body
LE: loop exit
PB: predicated region body
PF: predicated region fallthrough
CT: control target
= control target key end

     0   :  { %9 = vsyncpa [#allocation3], 0  ;;  %s1136_s0 = inlined_call_operand.hbm [shape: f32[8,310], index: 0, kind: input, shape index: {}]   ;;  %s1137_s1 = inlined_call_operand.hbm [shape: bf16[310,128], index: 1, kind: input, shape index: {}]   ;;  %s1138_s2 = inlined_call_operand.hbm [shape: bf16[4,128,128], index: 2, kind: input, shape index: {}]   ;;  %s1139_s3 = inlined_call_operand.hbm [shape: f32[5,128], index: 3, kind: input, shape index: {}]   ;;  %s1140_s4 = inlined_call_operand.hbm [shape: f32[8,128], index: 4, kind: output, shape index: {}]  }
   0x1   :  { %10 = vsyncpa [#allocation6], 0 }
   0x2   :  { %11 = vsyncpa [#allocation9], 0  ;;  %s28_s17 = sshll.u32 %s1137_s1, 4  ;;  %s29_s17 = int_to_ptr.hbm [resolvable:$true] %s28_s17 }
   0x3   :  { %12 = vsyncpa [#allocation4], 0  ;;  %s1068_s18 = smov [#allocation5]   ;;  %s18_s22 = sshll.u32 %s1136_s0, 4  ;;  %s19_s22 = int_to_ptr.hbm [resolvable:$true] %s18_s22 }
   0x4   :  { %s30_s19 = sshll.u32 %s1068_s18, 4  ;;  %s1069_s23 = smov 64   ;;  %s31_s19 = int_to_ptr.vmem [resolvable:$true] %s30_s19 }
   0x5   :  { %s1070_s24 = smov 4   ;;  %s1071_s25 = smov [#allocation2]  }
   0x6   :  { %36 = dma.hbm_to_vmem [thread:$0]  %s29_s17, 2496, %s31_s19, [#allocation6], %s1069_s23, %s1069_s23, %s1070_s24  }
   0x7   :  { %s20_s26 = sshll.u32 %s1071_s25, 4  ;;  %s41_s29 = sshll.u32 %s1138_s2, 4  ;;  %s21_s26 = int_to_ptr.vmem [resolvable:$true] %s20_s26  ;;  %s42_s29 = int_to_ptr.hbm [resolvable:$true] %s41_s29 }
   0x8   :  { %23 = dma.hbm_to_vmem [thread:$0]  %s19_s22, 384, %s21_s26, [#allocation3]  }
   0x9   :  { %s55_s5 = sshll.u32 %s1139_s3, 4  ;;  %s1072_s6 = smov [#allocation7]   ;;  %s56_s5 = int_to_ptr.hbm [resolvable:$true] %s55_s5 }
   0xa   :  { %s43_s7 = sshll.u32 %s1072_s6, 4  ;;  %s1073_s0 = smov [#allocation8]   ;;  %s44_s7 = int_to_ptr.vmem [resolvable:$true] %s43_s7 }
   0xb   :  { %49 = dma.hbm_to_vmem [thread:$0]  %s42_s29, 4096, %s44_s7, [#allocation6], %s1069_s23, %s1069_s23, %s1070_s24  }
   0xc   :  { %s57_s8 = sshll.u32 %s1073_s0, 4  ;;  %s58_s8 = int_to_ptr.vmem [resolvable:$true] %s57_s8 }
   0xd   :  { %60 = dma.hbm_to_vmem [thread:$0]  %s56_s5, 128, %s58_s8, [#allocation9]  }
   0xe   :  { %1060 = dma.done.wait [#allocation3], 384  }
   0xf   :  { %1061 = vsyncadd [#allocation3], 4294966912 }
  0x10   :  { %1062 = dma.done.wait [#allocation6], 6592  }
  0x11   :  { %1063 = vsyncadd [#allocation6], 4294960704 }
  0x12   :  { %1064 = dma.done.wait [#allocation9], 128  }
  0x13   :  { %1065 = vsyncadd [#allocation9], 4294967168  ;;  %v881_v0 = vld [vmem:[#allocation5 + $0x38] sm:$0xff]  ;;  %v880_v3 = vld [vmem:[#allocation5 + $0x30] sm:$0xff]  ;;  %vm246_vm0 = vcmask 1042432   ;;  %vm242_vm1 = vcmask 441344  }
  0x14   :  { %v889_v1 = vld [vmem:[#allocation5 + $0x78] sm:$0xff]  ;;  %250 = vmatpush.bf16.msra.mxu0 %v881_v0  ;;  %v888_v4 = vld [vmem:[#allocation5 + $0x70] sm:$0xff]  ;;  %v879_v8 = vld [vmem:[#allocation5 + $0x28] sm:$0xff]  ;;  %vm620_vm5 = vcmask 64512   ;;  %s1074_s2 = smov [#allocation10]   ;;  %s657_s11 = sshll.u32 %s1140_s4, 4  ;;  %s658_s11 = int_to_ptr.hbm [resolvable:$true] %s657_s11 }
  0x15   :  { %v123_v2 = vld [vmem:[#allocation5 + $0x98] sm:$0x7]  ;;  %263 = vmatpush.bf16.msra.mxu1 %v889_v1  ;;  %v887_v9 = vld [vmem:[#allocation5 + $0x68] sm:$0xff]  ;;  %v892_v10 = vld [vmem:[#allocation5 + $0x90] sm:$0xff]  ;;  %s655_s3 = sshll.u32 %s1074_s2, 4  ;;  %s656_s3 = int_to_ptr.vmem [resolvable:$true] %s655_s3 }
  0x16   :  { %v202_v5 = vunpack.c.l.b16 %v123_v2  ;;  %v900_v11 = vld [vmem:[#allocation7 + $0x38] sm:$0xff]  ;;  %v899_v12 = vld [vmem:[#allocation7 + $0x30] sm:$0xff]  ;;  %v878_v13 = vld [vmem:[#allocation5 + $0x20] sm:$0xff] }
  0x17   :  { %356 = vmatpush.bf16.msra.mxu3 %v900_v11  ;;  %v886_v14 = vld [vmem:[#allocation5 + $0x60] sm:$0xff]  ;;  %v891_v15 = vld [vmem:[#allocation5 + $0x88] sm:$0xff]  ;;  %v877_v17 = vld [vmem:[#allocation5 + $0x18] sm:$0xff] }
  0x18   :  { %v222_v6 = vpack.c.b16 %v202_v5, %v202_v5  ;;  %251 = vmatpush.bf16.msra.mxu0 %v880_v3  ;;  %v898_v16 = vld [vmem:[#allocation7 + $0x28] sm:$0xff]  ;;  %v885_v18 = vld [vmem:[#allocation5 + $0x58] sm:$0xff]  ;;  %v876_v22 = vld [vmem:[#allocation5 + $0x10] sm:$0xff] }
  0x19   :  { %264 = vmatpush.bf16.msra.mxu1 %v888_v4  ;;  %v890_v19 = vld [vmem:[#allocation5 + $0x80] sm:$0xff]  ;;  %v81_v20 = vld [vmem:[#allocation2 + $0x10] sm:$0xff]  ;;  %v884_v23 = vld [vmem:[#allocation5 + $0x50] sm:$0xff] }
  0x1a   :  { %v248_v7 = vsel %vm246_vm0, %v222_v6, 0  ;;  %v897_v21 = vld [vmem:[#allocation7 + $0x20] sm:$0xff]  ;;  %v84_v24 = vpack.c.bf16 %v81_v20, %v81_v20  ;;  %v875_v25 = vld [vmem:[#allocation5 + $0x8] sm:$0xff]  ;;  %v80_v30 = vld [vmem:[#allocation2 + $0x8] sm:$0xff] }
  0x1b   :  { %280 = vmatpush.bf16.msra.mxu2 %v248_v7  ;;  %357 = vmatpush.bf16.msra.mxu3 %v899_v12  ;;  %v883_v26 = vld [vmem:[#allocation5 + $0x48] sm:$0xff]  ;;  %v874_v27 = vld [vmem:[#allocation5] sm:$0xff]  ;;  %v83_v32 = vpack.c.bf16 %v80_v30, %v80_v30  ;;  %v896_v33 = vld [vmem:[#allocation7 + $0x18] sm:$0xff] }
  0x1c   :  { %252 = vmatpush.bf16.msra.mxu0 %v879_v8  ;;  %v882_v28 = vld [vmem:[#allocation5 + $0x40] sm:$0xff]  ;;  %v79_v29 = vld [vmem:[#allocation2] sm:$0xff]  ;;  %v908_v37 = vld [vmem:[#allocation7 + $0x78] sm:$0xff] }
  0x1d   :  { %265 = vmatpush.bf16.msra.mxu1 %v887_v9  ;;  %v82_v31 = vpack.c.bf16 %v79_v29, %v79_v29  ;;  %v895_v34 = vld [vmem:[#allocation7 + $0x10] sm:$0xff]  ;;  %v894_v35 = vld [vmem:[#allocation7 + $0x8] sm:$0xff]  ;;  %v893_v36 = vld [vmem:[#allocation7] sm:$0xff] }
  0x1e   :  { %v907_v38 = vld [vmem:[#allocation7 + $0x70] sm:$0xff]  ;;  %v906_v39 = vld [vmem:[#allocation7 + $0x68] sm:$0xff]  ;;  %v905_v40 = vld [vmem:[#allocation7 + $0x60] sm:$0xff] }
  0x1f   :  { %281 = vmatpush.bf16.msra.mxu2 %v892_v10  ;;  %358 = vmatpush.bf16.msra.mxu3 %v898_v16  ;;  %v904_v41 = vld [vmem:[#allocation7 + $0x58] sm:$0xff]  ;;  %v1112_v42 = vld [vmem:[#allocation8] sm:$0x1f]  ;;  %v903_v45 = vld [vmem:[#allocation7 + $0x50] sm:$0xff] }
  0x20   :  { %253 = vmatpush.bf16.msra.mxu0 %v878_v13  ;;  %v124_v44 = vperm.slane %v1112_v42, 0  ;;  %v902_v56 = vld [vmem:[#allocation7 + $0x48] sm:$0xff]  ;;  %v901_v57 = vld [vmem:[#allocation7 + $0x40] sm:$0xff]  ;;  %v916_v58 = vld [vmem:[#allocation7 + $0xb8] sm:$0xff]  ;;  %v307_v0 = vperm.slane %v1112_v42, 1  ;;  %v550_v30 = vperm.slane %v1112_v42, 4 }
  0x21   :  { %266 = vmatpush.bf16.msra.mxu1 %v886_v14  ;;  %v915_v59 = vld [vmem:[#allocation7 + $0xb0] sm:$0xff]  ;;  %v914_v60 = vld [vmem:[#allocation7 + $0xa8] sm:$0xff]  ;;  %v913_v61 = vld [vmem:[#allocation7 + $0xa0] sm:$0xff]  ;;  %v388_v14 = vperm.slane %v1112_v42, 2 }
  0x22   :  { %v912_v62 = vld [vmem:[#allocation7 + $0x98] sm:$0xff]  ;;  %v911_v63 = vld [vmem:[#allocation7 + $0x90] sm:$0xff]  ;;  %v910_v6 = vld [vmem:[#allocation7 + $0x88] sm:$0xff] }
  0x23   :  { %282 = vmatpush.bf16.msra.mxu2 %v891_v15  ;;  %359 = vmatpush.bf16.msra.mxu3 %v897_v21  ;;  %v909_v7 = vld [vmem:[#allocation7 + $0x80] sm:$0xff]  ;;  %v924_v8 = vld [vmem:[#allocation7 + $0xf8] sm:$0xff]  ;;  %v923_v9 = vld [vmem:[#allocation7 + $0xf0] sm:$0xff] }
  0x24   :  { %254 = vmatpush.bf16.msra.mxu0 %v877_v17  ;;  %v922_v10 = vld [vmem:[#allocation7 + $0xe8] sm:$0xff]  ;;  %v921_v11 = vld [vmem:[#allocation7 + $0xe0] sm:$0xff]  ;;  %v920_v12 = vld [vmem:[#allocation7 + $0xd8] sm:$0xff] }
  0x25   :  { %267 = vmatpush.bf16.msra.mxu1 %v885_v18  ;;  %v919_v13 = vld [vmem:[#allocation7 + $0xd0] sm:$0xff]  ;;  %v918_v20 = vld [vmem:[#allocation7 + $0xc8] sm:$0xff]  ;;  %v917_v21 = vld [vmem:[#allocation7 + $0xc0] sm:$0xff] }
  0x27   :  { %283 = vmatpush.bf16.msra.mxu2 %v890_v19  ;;  %360 = vmatpush.bf16.msra.mxu3 %v896_v33 }
  0x28   :  { %255 = vmatpush.bf16.msra.mxu0 %v876_v22  ;;  %v469_v22 = vperm.slane %v1112_v42, 3 }
  0x29   :  { %268 = vmatpush.bf16.msra.mxu1 %v884_v23 }
  0x2a   :  { %745 = vmatmul.msk.bf16.vlgmr.msra.gmra.mxu2 %vm242_vm1, %v84_v24 }
  0x2b   :  { %361 = vmatpush.bf16.msra.mxu3 %v895_v34  ;;  %437 = vmatpush.bf16.msrb.mxu2 %v908_v37 }
  0x2c   :  { %256 = vmatpush.bf16.msra.mxu0 %v875_v25 }
  0x2d   :  { %269 = vmatpush.bf16.msra.mxu1 %v883_v26 }
  0x2f   :  { %362 = vmatpush.bf16.msra.mxu3 %v894_v35  ;;  %438 = vmatpush.bf16.msrb.mxu2 %v907_v38 }
  0x30   :  { %257 = vmatpush.bf16.msra.mxu0 %v874_v27 }
  0x31   :  { %270 = vmatpush.bf16.msra.mxu1 %v882_v28  ;;  %v612_v28 = vlaneseq }
  0x33   :  { %258 = vmatmul.bf16.vlgmr.msra.gmra.mxu0 %v82_v31  ;;  %363 = vmatpush.bf16.msra.mxu3 %v893_v36  ;;  %v613_v29 = vand.u32 127, %v612_v28 }
  0x34   :  { %271 = vmatmul.bf16.vlgmr.msra.gmra.mxu1 %v83_v32  ;;  %439 = vmatpush.bf16.msrb.mxu2 %v906_v39 }
  0x35   :  { %518 = vmatpush.bf16.msrb.mxu0 %v916_v58  ;;  %599 = vmatpush.bf16.msrb.mxu1 %v924_v8  ;;  %vm616_vm2 = vcmp.ge.s32.totalorder %v613_v29, 3  ;;  %vm617_vm3 = vcmp.lt.s32.totalorder %v613_v29, 5  ;;  %vm614_vm6 = vcmp.lt.s32.totalorder %v613_v29, 3 }
  0x36   :  { %vm1119_vm4 = vmand %vm616_vm2, %vm617_vm3 }
  0x38   :  { %440 = vmatpush.bf16.msrb.mxu2 %v905_v40 }
  0x39   :  { %519 = vmatpush.bf16.msrb.mxu0 %v915_v59  ;;  %600 = vmatpush.bf16.msrb.mxu1 %v923_v9 }
  0x3c   :  { %441 = vmatpush.bf16.msrb.mxu2 %v904_v41 }
  0x3d   :  { %520 = vmatpush.bf16.msrb.mxu0 %v914_v60  ;;  %601 = vmatpush.bf16.msrb.mxu1 %v922_v10 }
  0x40   :  { %442 = vmatpush.bf16.msrb.mxu2 %v903_v45 }
  0x41   :  { %521 = vmatpush.bf16.msrb.mxu0 %v913_v61  ;;  %602 = vmatpush.bf16.msrb.mxu1 %v921_v11 }
  0x44   :  { %443 = vmatpush.bf16.msrb.mxu2 %v902_v56 }
  0x45   :  { %522 = vmatpush.bf16.msrb.mxu0 %v912_v62  ;;  %603 = vmatpush.bf16.msrb.mxu1 %v920_v12 }
  0x48   :  { %444 = vmatpush.bf16.msrb.mxu2 %v901_v57 }
  0x49   :  { %523 = vmatpush.bf16.msrb.mxu0 %v911_v63  ;;  %604 = vmatpush.bf16.msrb.mxu1 %v919_v13 }
  0x4d   :  { %524 = vmatpush.bf16.msrb.mxu0 %v910_v6  ;;  %605 = vmatpush.bf16.msrb.mxu1 %v918_v20 }
  0x51   :  { %525 = vmatpush.bf16.msrb.mxu0 %v909_v7  ;;  %606 = vmatpush.bf16.msrb.mxu1 %v917_v21 }
  0xad   :  { %v285_v43 = vpop.f32.mrf.mxu2 }
  0xb0   :  { %v259_v46 = vpop.f32.mrf.mxu0 }
  0xb1   :  { %v272_v47 = vpop.f32.mrf.mxu1  ;;  %v260_v48 = vadd.f32 %v259_v46, %v124_v44 }
  0xb3   :  { %v273_v49 = vadd.f32 %v272_v47, %v260_v48 }
  0xb5   :  { %v287_v50 = vpop.f32.mrf.mxu2  ;;  %v286_v51 = vadd.f32 %v285_v43, %v273_v49 }
  0xb7   :  { %v289_v52 = vmax.f32 %v286_v51, 0.0 }
  0xb8   :  { %v261_v53 = vpop.f32.mrf.mxu0 }
  0xb9   :  { %v274_v54 = vpop.f32.mrf.mxu1  ;;  %v290_v55 = vpack.c.bf16 %v289_v52, %v289_v52 }
  0xbb   :  { %364 = vmatmul.bf16.vlgmr.msra.gmra.mxu3 %v290_v55 }
 0x13e   :  { %v365_v1 = vpop.f32.mrf.mxu3 }
 0x13f   :  { %v366_v2 = vadd.f32 %v365_v1, %v307_v0 }
 0x141   :  { %v369_v3 = vmax.f32 %v366_v2, 0.0 }
 0x143   :  { %v370_v4 = vpack.c.bf16 %v369_v3, %v369_v3 }
 0x145   :  { %445 = vmatmul.bf16.vlgmr.msrb.gmra.mxu2 %v370_v4 }
 0x146   :  { %v367_v5 = vpop.f32.mrf.mxu3 }
 0x1c8   :  { %v446_v15 = vpop.f32.mrf.mxu2 }
 0x1c9   :  { %v447_v16 = vadd.f32 %v446_v15, %v388_v14 }
 0x1cb   :  { %v450_v17 = vmax.f32 %v447_v16, 0.0 }
 0x1cd   :  { %v451_v18 = vpack.c.bf16 %v450_v17, %v450_v17 }
 0x1cf   :  { %526 = vmatmul.bf16.vlgmr.msrb.gmra.mxu0 %v451_v18 }
 0x1d0   :  { %v448_v19 = vpop.f32.mrf.mxu2 }
 0x24c   :  { %v527_v23 = vpop.f32.mrf.mxu0 }
 0x24d   :  { %v528_v24 = vadd.f32 %v527_v23, %v469_v22 }
 0x24f   :  { %v531_v25 = vmax.f32 %v528_v24, 0.0 }
 0x251   :  { %v532_v26 = vpack.c.bf16 %v531_v25, %v531_v25 }
 0x253   :  { %607 = vmatmul.bf16.vlgmr.msrb.gmra.mxu1 %v532_v26 }
 0x254   :  { %v529_v27 = vpop.f32.mrf.mxu0 }
 0x2d0   :  { %v608_v31 = vpop.f32.mrf.mxu1 }
 0x2d1   :  { %v609_v33 = vadd.f32 %v608_v31, %v550_v30 }
 0x2d3   :  { %v619_v34 = vsel %vm1119_vm4, %v609_v33, -1e+30  ;;  %v615_v37 = vsel %vm614_vm6, %v609_v33, -1e+30 }
 0x2d4   :  { %v624_v35 = vsel %vm620_vm5, %v619_v34, -inf  ;;  %v621_v38 = vsel %vm620_vm5, %v615_v37, -inf }
 0x2d5   :  { %625 = vmax.xlane.f32.xlu0 %v624_v35 }
 0x2d8   :  { %v610_v36 = vpop.f32.mrf.mxu1 }
 0x2dd   :  { %622 = vmax.xlane.f32.xlu0 %v621_v38 }
 0x348   :  { %v626_v39 = vpop.xlane.xlu0 %625 }
 0x349   :  { %v636_v40 = vsub.f32 %v619_v34, %v626_v39 }
 0x34b   :  { %v637_v41 = vmul.f32 1.442695, %v636_v40 }
 0x34d   :  { %932 = vpow2.f32 %v637_v41 }
 0x350   :  { %v623_v42 = vpop.xlane.xlu0 %622 }
 0x351   :  { %v627_v43 = vsub.f32 %v615_v37, %v623_v42 }
 0x353   :  { %v933_v44 = vpop.eup %932  ;;  %v628_v45 = vmul.f32 1.442695, %v627_v43 }
 0x354   :  { %v639_v46 = vsel %vm620_vm5, %v933_v44, 0.0 }
 0x355   :  { %934 = vpow2.f32 %v628_v45  ;;  %640 = vadd.xlane.f32.xlu1 %v639_v46 }
 0x35b   :  { %v935_v47 = vpop.eup %934 }
 0x35c   :  { %v630_v48 = vsel %vm620_vm5, %v935_v47, 0.0 }
 0x35d   :  { %631 = vadd.xlane.f32.xlu1 %v630_v48 }
 0x3c8   :  { %v641_v49 = vpop.xlane.xlu1 %640 }
 0x3c9   :  { %936 = vlog2.f32 %v641_v49 }
 0x3cf   :  { %v937_v50 = vpop.eup %936 }
 0x3d0   :  { %v632_v51 = vpop.xlane.xlu1 %631  ;;  %v643_v52 = vmul.f32 0.6931472, %v937_v50 }
 0x3d1   :  { %938 = vlog2.f32 %v632_v51 }
 0x3d2   :  { %v644_v53 = vadd.f32 %v643_v52, %v626_v39 }
 0x3d4   :  { %v646_v56 = vsub.f32 %v609_v33, %v644_v53 }
 0x3d6   :  { %v647_v59 = vsel %vm1119_vm4, %v646_v56, 0.0 }
 0x3d7   :  { %v939_v54 = vpop.eup %938 }
 0x3d8   :  { %v634_v55 = vmul.f32 0.6931472, %v939_v54 }
 0x3da   :  { %v635_v57 = vadd.f32 %v634_v55, %v623_v42 }
 0x3dc   :  { %v645_v58 = vsub.f32 %v609_v33, %v635_v57 }
 0x3de   :  { %v648_v60 = vsel %vm614_vm6, %v645_v58, %v647_v59 }
 0x3df   :  { %649 = vst [vmem:[#allocation10] sm:$0xff] %v648_v60 }
 0x3e0   :  { %660 = dma.vmem_to_hbm [thread:$0]  %s656_s3, 128, %s658_s11, [#allocation4]  }
 0x3e1   :  { %1066 = dma.done.wait [#allocation4], 128  }
 0x3e2   :  { %1067 = vsyncadd [#allocation4], 4294967168 }
 0x3e3   :  { %665 = vsyncpa [#allocation3], 1 }
 0x3e4   :  { %666 = vsyncpa [#allocation6], 1 }
 0x3e5   :  { %667 = vsyncpa [#allocation9], 1 }
 0x3e6   :  { %668 = vsyncpa [#allocation4], 1 }

</bundles_post_ra>
